<compile_context>
chip_gen: v5e
topology: v5e:2x2
jax: 0.10.0
libtpu: 0.0.40
codegen_flags: <defaults>
</compile_context>

<pallas_src>
import jax
import jax.numpy as jnp
from jax.experimental import pallas as pl
from jax.experimental.pallas import tpu as pltpu


def weak_classifier_kernel(x_ref, w_ref, b_ref, o_ref):
    # x_ref : (TILE_B, D)  flattened input tile (VMEM, double-buffered)
    # w_ref : (1, D)       fused lane-major weight (w2 @ w1), resident across steps
    # b_ref : (1, 1)       fused scalar bias (SMEM)
    # o_ref : (1, TILE_B)  lane-dense output logits tile
    prod = x_ref[...] * w_ref[...]              # VPU mul, sublane-broadcast of w
    s = jnp.sum(prod, axis=-1)                  # XLU lane reduce -> (TILE_B,)
    o_ref[...] = (s + b_ref[0, 0])[None, :].astype(o_ref.dtype)


def _choose_tile_b(B: int, D: int, itemsize: int) -> int:
    """Pick the batch tile: VMEM-budgeted, lane-aligned, >=2 tiles for big B."""
    if B <= 128:
        # Single tile; block dims equal the full array dims, so the (8, 128)
        # tiling rule is satisfied without padding.
        return B
    # Budget for the double-buffered x tile: conservative so it fits v5e's
    # 16 MiB default scoped VMEM and v7x's per-TC VMEM with headroom for the
    # resident (1, D) weight and the tiny lane-dense output buffers.
    budget_bytes = 12 * 1024 * 1024
    max_tile = (budget_bytes // (2 * D * itemsize)) // 128 * 128
    max_tile = max(128, min(4096, max_tile))
    # Aim for at least 2 grid steps (v7x has 2 TensorCores; also gives the
    # pipeline something to overlap).
    want = ((pl.cdiv(B, 2) + 127) // 128) * 128
    return max(128, min(max_tile, want))


def weak_classifier_forward(x, w1, b1, w2, b2):
    """x: (B, C, H, W) or (B, D). w1: (5, D), b1: (5,), w2: (1, 5), b2: (1,)."""
    B = x.shape[0]
    x2d = x.reshape(B, -1)                      # nn.Flatten(start_dim=1), row-major
    D = x2d.shape[1]
    out_dtype = x2d.dtype
    itemsize = jnp.dtype(out_dtype).itemsize

    # ---- Algebraic fusion of the two linears (no nonlinearity in between) ----
    # (x @ w1.T + b1) @ w2.T + b2  ==  x @ (w2 @ w1).T + (b1 @ w2.T + b2)
    w_eff = (w2 @ w1).astype(out_dtype)                          # (1, D), lane-major
    b_eff = (b1 @ w2.T + b2).reshape(1, 1).astype(jnp.float32)   # scalar in SMEM

    TILE_B = _choose_tile_b(B, D, itemsize)
    num_tiles = pl.cdiv(B, TILE_B)              # ragged last tile handled by Pallas

    cost = pl.CostEstimate(
        flops=2 * B * D,
        transcendentals=0,
        bytes_accessed=B * D * itemsize + D * itemsize + B * itemsize,
    )

    out = pl.pallas_call(
        weak_classifier_kernel,
        out_shape=jax.ShapeDtypeStruct((1, B), out_dtype),       # lane-dense output
        grid=(num_tiles,),
        in_specs=[
            pl.BlockSpec((TILE_B, D), lambda i: (i, 0)),         # x tile (pipelined)
            pl.BlockSpec((1, D), lambda i: (0, 0)),              # fused weight (resident)
            pl.BlockSpec(memory_space=pltpu.SMEM),               # fused scalar bias
        ],
        out_specs=pl.BlockSpec((1, TILE_B), lambda i: (0, i)),
        compiler_params=pltpu.CompilerParams(
            dimension_semantics=("parallel",),
            vmem_limit_bytes=32 * 1024 * 1024,
        ),
        cost_estimate=cost,
    )(x2d, w_eff, b_eff)

    return out.reshape(B, 1)                     # contiguous reshape, effectively free


if __name__ == "__main__":
    key = jax.random.PRNGKey(0)
    k_x, k_w1, k_b1, k_w2, k_b2 = jax.random.split(key, 5)

    # Small shapes consistent with the module: batch=2, channels=4, spatial=16x16
    B, C, H, W = 2, 4, 16, 16
    input_dim = C * H * W  # 1024

    x = jax.random.normal(k_x, (B, C, H, W), dtype=jnp.float32)

    # Deterministic parameter init (mimicking torch.nn.Linear's uniform(+-1/sqrt(fan_in))).
    bound1 = 1.0 / (input_dim ** 0.5)
    w1 = jax.random.uniform(k_w1, (5, input_dim), minval=-bound1, maxval=bound1, dtype=jnp.float32)
    b1 = jax.random.uniform(k_b1, (5,), minval=-bound1, maxval=bound1, dtype=jnp.float32)
    bound2 = 1.0 / (5 ** 0.5)
    w2 = jax.random.uniform(k_w2, (1, 5), minval=-bound2, maxval=bound2, dtype=jnp.float32)
    b2 = jax.random.uniform(k_b2, (1,), minval=-bound2, maxval=bound2, dtype=jnp.float32)

    out = weak_classifier_forward(x, w1, b1, w2, b2)
    out = jax.block_until_ready(out)

    # Reference check in plain JAX (same math as the PyTorch two-matmul path).
    x2d = x.reshape(B, -1)
    ref = (x2d @ w1.T + b1) @ w2.T + b2
    assert out.shape == (B, 1)
    assert jnp.allclose(out, ref, atol=1e-5, rtol=1e-5)

    print("KERNEL_OK")
</pallas_src>

<mosaic_0001>
module attributes {stable_mosaic.version = 11 : i64} {
  func.func @weak_classifier_kernel(%arg0: i32, %arg1: memref<2x1024xf32, #tpu.memory_space<vmem>>, %arg2: memref<1x1024xf32, #tpu.memory_space<vmem>>, %arg3: memref<1x1xf32, #tpu.memory_space<smem>>, %arg4: memref<1x2xf32, #tpu.memory_space<vmem>>) attributes {dimension_semantics = [#tpu.dimension_semantics<parallel>], iteration_bounds = array<i64: 1>, scalar_prefetch = 0 : i64, scratch_operands = 0 : i64, tpu.core_type = #tpu.core_type<tc>, window_params = [{transform_indices = @transform_0, window_bounds = array<i64: 2, 1024>}, {pipeline_mode = #tpu.pipeline_mode<synchronous>, transform_indices = @transform_1, window_bounds = array<i64: 1, 1024>}, {transform_indices = @transform_2, window_bounds = array<i64: 1, 1>}, {transform_indices = @transform_3, window_bounds = array<i64: 1, 2>}]} {
    %c0 = arith.constant 0 : index
    %c0_0 = arith.constant 0 : index
    %0 = vector.load %arg1[%c0, %c0_0] : memref<2x1024xf32, #tpu.memory_space<vmem>>, vector<2x1024xf32>
    %c0_1 = arith.constant 0 : index
    %c0_2 = arith.constant 0 : index
    %1 = vector.load %arg2[%c0_1, %c0_2] : memref<1x1024xf32, #tpu.memory_space<vmem>>, vector<1x1024xf32>
    %2 = vector.broadcast %1 : vector<1x1024xf32> to vector<2x1024xf32>
    %3 = arith.mulf %0, %2 : vector<2x1024xf32>
    %cst = arith.constant dense<0.000000e+00> : vector<2xf32>
    %4 = vector.multi_reduction <add>, %3, %cst [1] : vector<2x1024xf32> to vector<2xf32>
    %c0_3 = arith.constant 0 : index
    %c0_4 = arith.constant 0 : index
    %5 = memref.load %arg3[%c0_3, %c0_4] : memref<1x1xf32, #tpu.memory_space<smem>>
    %6 = vector.broadcast %5 : f32 to vector<2xf32>
    %7 = arith.addf %4, %6 : vector<2xf32>
    %8 = vector.shape_cast %7 : vector<2xf32> to vector<1x2xf32>
    %c0_5 = arith.constant 0 : index
    %c0_6 = arith.constant 0 : index
    %9 = vector.load %arg4[%c0_5, %c0_6] : memref<1x2xf32, #tpu.memory_space<vmem>>, vector<1x2xf32>
    tpu.vector_store %arg4[%c0_5, %c0_6], %8 {strides = array<i32>} : memref<1x2xf32, #tpu.memory_space<vmem>>, vector<1x2xf32>,
    return
  }
  func.func @transform_0(%arg0: i32) -> (i32, i32) {
    %c0_i32 = arith.constant 0 : i32
    %c0_i32_0 = arith.constant 0 : i32
    return %arg0, %c0_i32 : i32, i32
  }
  func.func @transform_1(%arg0: i32) -> (i32, i32) {
    %c0_i32 = arith.constant 0 : i32
    %c0_i32_0 = arith.constant 0 : i32
    %c0_i32_1 = arith.constant 0 : i32
    return %c0_i32, %c0_i32_0 : i32, i32
  }
  func.func @transform_2(%arg0: i32) -> (i32, i32) {
    %c0_i32 = arith.constant 0 : i32
    %c0_i32_0 = arith.constant 0 : i32
    %c0_i32_1 = arith.constant 0 : i32
    return %c0_i32, %c0_i32_0 : i32, i32
  }
  func.func @transform_3(%arg0: i32) -> (i32, i32) {
    %c0_i32 = arith.constant 0 : i32
    %c0_i32_0 = arith.constant 0 : i32
    return %c0_i32, %arg0 : i32, i32
  }
}

</mosaic_0001>

<bundles_post_ra>
// kernel: tpu_custom_call.1
= control target key start
LH: loop header
LB: loop body
LE: loop exit
PB: predicated region body
PF: predicated region fallthrough
CT: control target
= control target key end

     0   :  { %9 = vsyncpa [#allocation4], 0  ;;  %s269_s0 = inlined_call_operand.hbm [shape: f32[2,1024], index: 0, kind: input, shape index: {}]   ;;  %s270_s1 = inlined_call_operand.hbm [shape: f32[1,1024], index: 1, kind: input, shape index: {}]   ;;  %s271_s2 = inlined_call_operand.<no memory space> [shape: f32[1,1], index: 2, kind: input, shape index: {}]   ;;  %s272_s3 = inlined_call_operand.hbm [shape: f32[1,2], index: 3, kind: output, shape index: {}]  }
   0x1   :  { %10 = vsyncpa [#allocation7], 0 }
   0x2   :  { %11 = vsyncpa [#allocation5], 0  ;;  %s17_s14 = sshll.u32 %s269_s0, 4  ;;  %s222_s15 = smov [#allocation3]   ;;  %s18_s14 = int_to_ptr.hbm [resolvable:$true] %s17_s14 }
   0x3   :  { %s19_s16 = sshll.u32 %s222_s15, 4  ;;  %s28_s19 = sshll.u32 %s270_s1, 4  ;;  %s20_s16 = int_to_ptr.vmem [resolvable:$true] %s19_s16  ;;  %s29_s19 = int_to_ptr.hbm [resolvable:$true] %s28_s19 }
   0x4   :  { %22 = dma.hbm_to_vmem [thread:$0]  %s18_s14, 256, %s20_s16, [#allocation4]  }
   0x5   :  { %s223_s20 = smov [#allocation6]  }
   0x6   :  { %s30_s21 = sshll.u32 %s223_s20, 4  ;;  %s31_s21 = int_to_ptr.vmem [resolvable:$true] %s30_s21 }
   0x7   :  { %33 = dma.hbm_to_vmem [thread:$0]  %s29_s19, 128, %s31_s21, [#allocation7]  }
   0x8   :  { %216 = dma.done.wait [#allocation4], 256  }
   0x9   :  { %217 = vsyncadd [#allocation4], 4294967040 }
   0xa   :  { %218 = dma.done.wait [#allocation7], 128  }
   0xb   :  { %219 = vsyncadd [#allocation7], 4294967168  ;;  %v46_v0 = vld [vmem:[#allocation6] sm:$0xff]  ;;  %vm62_vm0 = vcmask 1041408   ;;  %vm64_vm1 = vcmask 1045508   ;;  %vm66_vm2 = vcmask 1043456   ;;  %v117_v48 = vlaneseq }
   0xc   :  { %v48_v1 = vperm.slane %v46_v0, 0  ;;  %v49_v2 = vperm.slane %v46_v0, 1  ;;  %v50_v3 = vperm.slane %v46_v0, 2  ;;  %v51_v4 = vperm.slane %v46_v0, 3  ;;  %v44_v12 = vld [vmem:[#allocation3] sm:$0xff]  ;;  %v45_v16 = vld [vmem:[#allocation3 + $0x8] sm:$0xff] }
   0xd   :  { %v52_v5 = vperm.slane %v46_v0, 4  ;;  %v53_v6 = vperm.slane %v46_v0, 5  ;;  %v54_v7 = vperm.slane %v46_v0, 6  ;;  %v55_v8 = vperm.slane %v46_v0, 7  ;;  %s224_s22 = smov [#allocation8]   ;;  %s130_s26 = sshll.u32 %s272_s3, 4  ;;  %s131_s26 = int_to_ptr.hbm [resolvable:$true] %s130_s26 }
   0xe   :  { %v56_v9 = vrot.slane %v49_v2, 6  ;;  %v57_v10 = vrot.slane %v50_v3, 4  ;;  %v58_v11 = vrot.slane %v51_v4, 2  ;;  %v114_v49 = vstv %s271_s2  ;;  %s128_s23 = sshll.u32 %s224_s22, 4  ;;  %s129_s23 = int_to_ptr.vmem [resolvable:$true] %s128_s23 }
   0xf   :  { %v59_v13 = vrot.slane %v53_v6, 6  ;;  %v60_v14 = vrot.slane %v54_v7, 4  ;;  %v61_v15 = vrot.slane %v55_v8, 2  ;;  %v118_v50 = vand.u32 127, %v117_v48 }
  0x10   :  { %v63_v17 = vsel %vm62_vm0, %v48_v1, %v56_v9  ;;  %v65_v18 = vsel %vm64_vm1, %v57_v10, %v58_v11  ;;  %vm121_vm3 = vcmask 8192  }
  0x11   :  { %v67_v19 = vsel %vm66_vm2, %v63_v17, %v65_v18  ;;  %v68_v20 = vsel %vm62_vm0, %v52_v5, %v59_v13  ;;  %v69_v21 = vsel %vm64_vm1, %v60_v14, %v61_v15 }
  0x12   :  { %v70_v22 = vsel %vm66_vm2, %v68_v20, %v69_v21  ;;  %v73_v23 = vmul.f32 %v67_v19, %v44_v12 }
  0x13   :  { %v74_v24 = vmul.f32 %v70_v22, %v45_v16 }
  0x14   :  { %77 = vst [vmem:[#allocation1] ss:$4 sm:$0xff] %v73_v23 }
  0x15   :  { %79 = vst [vmem:[#allocation1 + $0x20] ss:$4 sm:$0xff] %v74_v24 }
  0x1b   :  { %v80_v25 = vld.sshfl [vmem:[#allocation1] sm:$0xff pattern:$0x73625140]  ;;  %v81_v26 = vld.sshfl [vmem:[#allocation1 + $0x8] sm:$0xff pattern:$0x73625140] }
  0x1c   :  { %v82_v27 = vld.sshfl [vmem:[#allocation1 + $0x10] sm:$0xff pattern:$0x73625140]  ;;  %v83_v28 = vld.sshfl [vmem:[#allocation1 + $0x18] sm:$0xff pattern:$0x73625140] }
  0x1d   :  { %v96_v29 = vsel %vm62_vm0, %v80_v25, 0.0  ;;  %v97_v30 = vsel %vm62_vm0, %v81_v26, 0.0  ;;  %v99_v31 = vsel %vm62_vm0, %v82_v27, 0.0  ;;  %v84_v32 = vld.sshfl [vmem:[#allocation1 + $0x20] sm:$0xff pattern:$0x73625140] }
  0x1e   :  { %v98_v33 = vadd.f32 %v97_v30, %v96_v29  ;;  %v101_v34 = vsel %vm62_vm0, %v83_v28, 0.0  ;;  %v85_v35 = vld.sshfl [vmem:[#allocation1 + $0x28] sm:$0xff pattern:$0x73625140]  ;;  %v103_v37 = vsel %vm62_vm0, %v84_v32, 0.0 }
  0x1f   :  { %v86_v38 = vld.sshfl [vmem:[#allocation1 + $0x30] sm:$0xff pattern:$0x73625140]  ;;  %v105_v40 = vsel %vm62_vm0, %v85_v35, 0.0 }
  0x20   :  { %v100_v36 = vadd.f32 %v99_v31, %v98_v33  ;;  %v87_v41 = vld.sshfl [vmem:[#allocation1 + $0x38] sm:$0xff pattern:$0x73625140]  ;;  %v107_v43 = vsel %vm62_vm0, %v86_v38, 0.0 }
  0x21   :  { %v109_v45 = vsel %vm62_vm0, %v87_v41, 0.0 }
  0x22   :  { %v102_v39 = vadd.f32 %v101_v34, %v100_v36 }
  0x24   :  { %v104_v42 = vadd.f32 %v103_v37, %v102_v39 }
  0x26   :  { %v106_v44 = vadd.f32 %v105_v40, %v104_v42 }
  0x28   :  { %v108_v46 = vadd.f32 %v107_v43, %v106_v44 }
  0x2a   :  { %v110_v47 = vadd.f32 %v109_v45, %v108_v46 }
  0x2c   :  { %111 = vadd.xlane.f32.xlu0 %v110_v47 }
  0x9f   :  { %v112_v51 = vpop.xlane.xlu0 %111 }
  0xa0   :  { %v115_v52 = vadd.f32 %v114_v49, %v112_v51 }
  0xa2   :  { %v119_v53 = vperm.slane %v115_v52, %v118_v50 }
  0xa4   :  { %122 = vst.msk [vmem:[#allocation8] sm:$0x1] %vm121_vm3, %v119_v53 }
  0xa5   :  { %133 = dma.vmem_to_hbm [thread:$0]  %s129_s23, 16, %s131_s26, [#allocation5]  }
  0xa6   :  { %220 = dma.done.wait [#allocation5], 16  }
  0xa7   :  { %221 = vsyncadd [#allocation5], 4294967280 }
  0xa8   :  { %138 = vsyncpa [#allocation4], 1 }
  0xa9   :  { %139 = vsyncpa [#allocation7], 1 }
  0xaa   :  { %140 = vsyncpa [#allocation5], 1 }

</bundles_post_ra>
